<compile_context>
chip_gen: v5e
topology: v5e:2x2
jax: 0.10.0
libtpu: 0.0.40
codegen_flags: <defaults>
</compile_context>

<pallas_src>
import functools
import math

import jax
import jax.numpy as jnp
from jax.experimental import pallas as pl
from jax.experimental.pallas import tpu as pltpu


def _round_up(x, m):
    return ((x + m - 1) // m) * m


def _vmem_capacity_bytes():
    try:
        return int(pltpu.get_tpu_info().vmem_capacity_bytes)
    except Exception:
        return 64 * 1024 * 1024  # conservative fallback (v7x per-TC physical)


def _choose_tile_and_vmem(n, k, dout, x_bytes, out_bytes, w_bytes, tm_max):
    """Pick a (multiple-of-128) row tile and an explicit scoped-VMEM limit.

    Pads N only to the next multiple of 128; shrinks the tile if the
    double-buffered working set would exceed the per-generation VMEM budget.
    """
    cap = _vmem_capacity_bytes()
    budget = min(cap // 2, 96 << 20)

    def working_set(t):
        return (2 * t * k * x_bytes          # feats stream, double-buffered
                + 2 * t * dout * out_bytes   # fused Q/classes output, double-buffered
                + 2 * dout * k * w_bytes     # stacked weight (invariant, still 2 bufs)
                + 2 * dout * 4)              # stacked bias

    tm = max(128, min(tm_max, _round_up(n, 128)))
    while tm > 128 and working_set(tm) > budget:
        tm -= 128
    vmem_limit = int(min(cap - (4 << 20), max(working_set(tm) + (8 << 20), 32 << 20)))
    return tm, vmem_limit


# ---------------------------------------------------------------------------
# Kernel 1: fused instance projection (attention queries + class scores)
#   out = feats @ [Wq; Wi; 0]^T + [bq; bi; 0]     (one MXU pass per tile)
# ---------------------------------------------------------------------------
def _instance_proj_kernel(x_ref, w_ref, b_ref, out_ref):
    y = jax.lax.dot_general(
        x_ref[...], w_ref[...],
        dimension_numbers=(((1,), (1,)), ((), ())),   # contract feature axes; no W^T copy
        preferred_element_type=jnp.float32)
    out_ref[...] = (y + b_ref[...]).astype(out_ref.dtype)


def _instance_projection(x, w_stacked, b_stacked, *, tm, vmem_limit):
    n, k = x.shape
    dout = w_stacked.shape[0]
    grid = (pl.cdiv(n, tm),)                           # ragged tail handled by Pallas
    return pl.pallas_call(
        _instance_proj_kernel,
        out_shape=jax.ShapeDtypeStruct((n, dout), jnp.float32),
        grid_spec=pltpu.PrefetchScalarGridSpec(
            num_scalar_prefetch=0,
            grid=grid,
            in_specs=[
                pl.BlockSpec((tm, k), lambda i: (i, 0)),     # feats stream (only HBM traffic/step)
                pl.BlockSpec((dout, k), lambda i: (0, 0)),   # stacked weight (resident)
                pl.BlockSpec((1, dout), lambda i: (0, 0)),   # stacked bias (resident)
            ],
            out_specs=pl.BlockSpec((tm, dout), lambda i: (i, 0)),  # lane-dense 256-wide stores
        ),
        compiler_params=pltpu.CompilerParams(
            dimension_semantics=("parallel",),
            vmem_limit_bytes=vmem_limit),
    )(x, w_stacked, b_stacked)


# ---------------------------------------------------------------------------
# Kernel 2: streaming bag pooling  B = A^T @ V  for large bags
#   A^T is tiny -> fully resident; only feats streams from HBM per step.
# ---------------------------------------------------------------------------
def _bag_pool_kernel(at_ref, x_ref, b_ref, acc_ref, *, n_valid, tm):
    i = pl.program_id(0)

    @pl.when(i == 0)
    def _init():
        acc_ref[...] = jnp.zeros_like(acc_ref)

    start = pl.multiple_of(i * tm, 128)
    at_tile = at_ref[:, pl.ds(start, tm)]                     # slice of resident A^T
    row = jax.lax.broadcasted_iota(jnp.int32, (tm, 1), 0) + i * tm
    x = jnp.where(row < n_valid, x_ref[...], 0)               # zero garbage ragged-tail rows
    acc_ref[...] += jnp.dot(at_tile, x, preferred_element_type=jnp.float32)

    @pl.when(i == pl.num_programs(0) - 1)
    def _finalize():
        b_ref[...] = acc_ref[...].astype(b_ref.dtype)


def _bag_pool_streaming(a_t, x, *, tm, vmem_limit):
    c, n = a_t.shape
    _, k = x.shape
    steps = pl.cdiv(n, tm)
    n_pad = steps * tm
    # A^T is C x N (a few KB..MB); padding/keeping it resident is cheap.
    # TODO(synk): for extremely large bags (C*N approaching VMEM) A^T should be blocked too.
    a_t_p = jnp.pad(a_t, ((0, 0), (0, n_pad - n))) if n_pad != n else a_t
    return pl.pallas_call(
        functools.partial(_bag_pool_kernel, n_valid=n, tm=tm),
        out_shape=jax.ShapeDtypeStruct((c, k), jnp.float32),
        grid_spec=pltpu.PrefetchScalarGridSpec(
            num_scalar_prefetch=0,
            grid=(steps,),
            in_specs=[
                pl.BlockSpec((c, n_pad), lambda i: (0, 0)),  # A^T resident (invariant)
                pl.BlockSpec((tm, k), lambda i: (i, 0)),     # feats stream
            ],
            out_specs=pl.BlockSpec((c, k), lambda i: (0, 0)),
            scratch_shapes=[pltpu.VMEM((c, k), jnp.float32)],
        ),
        compiler_params=pltpu.CompilerParams(
            dimension_semantics=("arbitrary",),
            vmem_limit_bytes=vmem_limit),
    )(a_t_p, x)


# ---------------------------------------------------------------------------
# MILNet forward
# ---------------------------------------------------------------------------
def milnet_forward(feats, params, *, tm_max=1024, mxu_dtype=None,
                   force_pallas_bag_pool=False):
    """MILNet.forward: returns (classes, prediction_bag, A, B)."""
    n, k = feats.shape
    c = params["i_w"].shape[0]
    dq = params["q_w"].shape[0]

    x_dtype = jnp.dtype(mxu_dtype) if mxu_dtype is not None else feats.dtype
    x = feats.astype(x_dtype)

    # ---- fused i_classifier (FCLayer) + attention-query projection --------
    # Stack [Wq; Wi] and pad the output dim to a lane multiple (130 -> 256):
    # the class head rides the Q matmul for free in one full MXU tile.
    dout = _round_up(dq + c, 128)
    pad_rows = dout - (dq + c)
    w_stacked = jnp.concatenate(
        [params["q_w"], params["i_w"],
         jnp.zeros((pad_rows, k), params["q_w"].dtype)], axis=0).astype(x_dtype)
    b_stacked = jnp.concatenate(
        [params["q_b"], params["i_b"],
         jnp.zeros((pad_rows,), params["q_b"].dtype)]).astype(jnp.float32).reshape(1, dout)

    tm, vmem_limit = _choose_tile_and_vmem(
        n, k, dout, x.dtype.itemsize, 4, x.dtype.itemsize, tm_max)

    proj = _instance_projection(x, w_stacked, b_stacked, tm=tm, vmem_limit=vmem_limit)
    Q = proj[:, :dq]                                    # [N, Dq] f32
    classes = proj[:, dq:dq + c]                        # [N, C]  f32

    # ---- b_classifier (DSMIL BClassifier, linear q, identity v) -----------
    # TODO(synk): argmax over MXU-f32 class scores; a near-tie vs the
    # HIGHEST-precision torch path could flip the critical instance.
    crit = jnp.argmax(classes, axis=0)                  # critical instance per class [C]
    m_feats = jnp.take(feats, crit, axis=0)             # [C, K]
    q_max = jax.lax.dot_general(                        # q(m_feats): [C, Dq]
        m_feats.astype(jnp.float32), params["q_w"].astype(jnp.float32),
        dimension_numbers=(((1,), (1,)), ((), ())),
        preferred_element_type=jnp.float32) + params["q_b"][None, :]

    scores = jax.lax.dot_general(                       # Q @ q_max^T : [N, C]
        Q, q_max,
        dimension_numbers=(((1,), (1,)), ((), ())),
        preferred_element_type=jnp.float32) / jnp.sqrt(jnp.float32(dq))
    A = jax.nn.softmax(scores, axis=0)                  # softmax over instances

    # ---- bag pooling  B = A^T @ V  (V = feats, identity v) ----------------
    feats_bytes = n * k * x.dtype.itemsize
    if force_pallas_bag_pool or feats_bytes > (8 << 20):
        B = _bag_pool_streaming(A.T.astype(x_dtype), x, tm=tm, vmem_limit=vmem_limit)
    else:
        # Tiny bag: a streaming Pallas reduction is pure launch/grid overhead at C=2.
        B = jnp.dot(A.T, feats.astype(jnp.float32),
                    precision=jax.lax.Precision.HIGHEST)

    # fcc = Conv1d(C, C, kernel_size=K) over B[1, C, K]  ==  tiny full linear.
    prediction_bag = jnp.dot(
        B.reshape(1, c * k),
        params["fcc_w"].reshape(c, c * k).T.astype(jnp.float32),
        precision=jax.lax.Precision.HIGHEST) + params["fcc_b"][None, :]

    return classes, prediction_bag, A, B.reshape(1, c, k)


if __name__ == "__main__":
    key = jax.random.PRNGKey(0)
    kf, k1, k2, k3, k4, k5, k6 = jax.random.split(key, 7)

    # Small MIL bag: N instances (ragged, not a multiple of any tile), K features.
    N, in_size, n_classes, q_dim = 300, 256, 2, 128

    feats = jax.random.normal(kf, (N, in_size), dtype=jnp.float32)

    def _uni(k, shape, fan_in):
        bound = 1.0 / math.sqrt(fan_in)
        return jax.random.uniform(k, shape, jnp.float32, -bound, bound)

    params = {
        "i_w": _uni(k1, (n_classes, in_size), in_size),          # FCLayer weight
        "i_b": _uni(k2, (n_classes,), in_size),                  # FCLayer bias
        "q_w": _uni(k3, (q_dim, in_size), in_size),              # BClassifier.q
        "q_b": _uni(k4, (q_dim,), in_size),
        "fcc_w": _uni(k5, (n_classes, n_classes, in_size), n_classes * in_size),
        "fcc_b": _uni(k6, (n_classes,), n_classes * in_size),
    }

    milnet = jax.jit(milnet_forward)
    classes, prediction_bag, A, B = milnet(feats, params)
    jax.block_until_ready((classes, prediction_bag, A, B))

    # Also exercise the streaming (large-bag) Pallas bag-pool path.
    milnet_stream = jax.jit(functools.partial(milnet_forward, force_pallas_bag_pool=True))
    _, pred2, _, B2 = milnet_stream(feats, params)
    jax.block_until_ready((pred2, B2))

    # ---- plain-JAX reference (PyTorch MILNet / DSMIL semantics) ----
    hp = jax.lax.Precision.HIGHEST
    classes_ref = jnp.dot(feats, params["i_w"].T, precision=hp) + params["i_b"]
    Q_ref = jnp.dot(feats, params["q_w"].T, precision=hp) + params["q_b"]
    crit_ref = jnp.argmax(classes_ref, axis=0)          # sort desc, take row 0
    m_feats_ref = feats[crit_ref]
    q_max_ref = jnp.dot(m_feats_ref, params["q_w"].T, precision=hp) + params["q_b"]
    A_ref = jax.nn.softmax(
        jnp.dot(Q_ref, q_max_ref.T, precision=hp) / jnp.sqrt(jnp.float32(q_dim)),
        axis=0)
    B_ref = jnp.dot(A_ref.T, feats, precision=hp)
    pred_ref = jnp.dot(B_ref.reshape(1, -1),
                       params["fcc_w"].reshape(n_classes, -1).T,
                       precision=hp) + params["fcc_b"]

    def _ok(a, b):
        return bool(jnp.allclose(a, b, rtol=2e-3, atol=2e-3))

    assert classes.shape == (N, n_classes)
    assert prediction_bag.shape == (1, n_classes)
    assert A.shape == (N, n_classes)
    assert B.shape == (1, n_classes, in_size)
    assert _ok(classes, classes_ref), "classes mismatch vs reference"
    assert _ok(A, A_ref), "attention scores mismatch vs reference"
    assert _ok(B[0], B_ref), "bag representation mismatch vs reference"
    assert _ok(prediction_bag, pred_ref), "bag prediction mismatch vs reference"
    assert _ok(B2[0], B_ref), "streaming bag-pool mismatch vs reference"
    assert _ok(pred2, pred_ref), "streaming-path bag prediction mismatch vs reference"

    print("KERNEL_OK")
</pallas_src>

<mosaic_0001>
module attributes {stable_mosaic.version = 11 : i64} {
  func.func @_instance_proj_kernel(%arg0: i32, %arg1: memref<384x256xf32, #tpu.memory_space<vmem>>, %arg2: memref<256x256xf32, #tpu.memory_space<vmem>>, %arg3: memref<1x256xf32, #tpu.memory_space<vmem>>, %arg4: memref<384x256xf32, #tpu.memory_space<vmem>>) attributes {dimension_semantics = [#tpu.dimension_semantics<parallel>], iteration_bounds = array<i64: 1>, scalar_prefetch = 0 : i64, scratch_operands = 0 : i64, tpu.core_type = #tpu.core_type<tc>, window_params = [{transform_indices = @transform_0, window_bounds = array<i64: 384, 256>}, {pipeline_mode = #tpu.pipeline_mode<synchronous>, transform_indices = @transform_1, window_bounds = array<i64: 256, 256>}, {pipeline_mode = #tpu.pipeline_mode<synchronous>, transform_indices = @transform_2, window_bounds = array<i64: 1, 256>}, {transform_indices = @transform_3, window_bounds = array<i64: 384, 256>}]} {
    %c0 = arith.constant 0 : index
    %c0_0 = arith.constant 0 : index
    %0 = vector.load %arg1[%c0, %c0_0] : memref<384x256xf32, #tpu.memory_space<vmem>>, vector<384x256xf32>
    %c0_1 = arith.constant 0 : index
    %c0_2 = arith.constant 0 : index
    %1 = vector.load %arg2[%c0_1, %c0_2] : memref<256x256xf32, #tpu.memory_space<vmem>>, vector<256x256xf32>
    %cst = arith.constant dense<0.000000e+00> : vector<384x256xf32>
    %2 = tpu.matmul %0, %1, %cst {dimension_numbers = #tpu.dot_dimension_numbers<[1], [1], [0], [0], [0, 0, 1, 0], [], []>} : vector<384x256xf32>, vector<256x256xf32>, vector<384x256xf32> -> vector<384x256xf32>
    %c0_3 = arith.constant 0 : index
    %c0_4 = arith.constant 0 : index
    %3 = vector.load %arg3[%c0_3, %c0_4] : memref<1x256xf32, #tpu.memory_space<vmem>>, vector<1x256xf32>
    %4 = vector.broadcast %3 : vector<1x256xf32> to vector<384x256xf32>
    %5 = arith.addf %2, %4 : vector<384x256xf32>
    %c0_5 = arith.constant 0 : index
    %c0_6 = arith.constant 0 : index
    %6 = vector.load %arg4[%c0_5, %c0_6] : memref<384x256xf32, #tpu.memory_space<vmem>>, vector<384x256xf32>
    tpu.vector_store %arg4[%c0_5, %c0_6], %5 {strides = array<i32>} : memref<384x256xf32, #tpu.memory_space<vmem>>, vector<384x256xf32>,
    return
  }
  func.func @transform_0(%arg0: i32) -> (i32, i32) {
    %c0_i32 = arith.constant 0 : i32
    %c0_i32_0 = arith.constant 0 : i32
    return %arg0, %c0_i32 : i32, i32
  }
  func.func @transform_1(%arg0: i32) -> (i32, i32) {
    %c0_i32 = arith.constant 0 : i32
    %c0_i32_0 = arith.constant 0 : i32
    %c0_i32_1 = arith.constant 0 : i32
    return %c0_i32, %c0_i32_0 : i32, i32
  }
  func.func @transform_2(%arg0: i32) -> (i32, i32) {
    %c0_i32 = arith.constant 0 : i32
    %c0_i32_0 = arith.constant 0 : i32
    %c0_i32_1 = arith.constant 0 : i32
    return %c0_i32, %c0_i32_0 : i32, i32
  }
  func.func @transform_3(%arg0: i32) -> (i32, i32) {
    %c0_i32 = arith.constant 0 : i32
    %c0_i32_0 = arith.constant 0 : i32
    return %arg0, %c0_i32 : i32, i32
  }
}

</mosaic_0001>

<bundles_post_ra>
// kernel: milnet_forward.1
= control target key start
LH: loop header
LB: loop body
LE: loop exit
PB: predicated region body
PF: predicated region fallthrough
CT: control target
= control target key end

     0   :  { %s1906_s0 = inlined_call_operand.vmem [shape: f32[300,256], index: 0, kind: input, shape index: {}]   ;;  %s1907_s1 = inlined_call_operand.vmem [shape: f32[256,256], index: 1, kind: input, shape index: {}]   ;;  %s1908_s2 = inlined_call_operand.vmem [shape: f32[1,256], index: 2, kind: input, shape index: {}]   ;;  %s1909_s3 = inlined_call_operand.vmem [shape: f32[300,256], index: 3, kind: output, shape index: {}]  }
   0x1   :  { %v172_v0 = vld [vmem:[%s1907_s1 + $0x1f0] sm:$0xff]  ;;  %v173_v1 = vld [vmem:[%s1907_s1 + $0x1f8] sm:$0xff]  ;;  %v170_v4 = vld [vmem:[%s1907_s1 + $0x1e0] sm:$0xff] }
   0x2   :  { %v140_v2 = vld [vmem:[%s1907_s1 + $0xf0] sm:$0xff]  ;;  %502 = vmatpush.xpose.msra.mxu2 %v172_v0  ;;  %663 = vmatpush.xpose.msra.mxu3 %v173_v1  ;;  %v141_v3 = vld [vmem:[%s1907_s1 + $0xf8] sm:$0xff]  ;;  %v171_v5 = vld [vmem:[%s1907_s1 + $0x1e8] sm:$0xff] }
   0x3   :  { %180 = vmatpush.xpose.msra.mxu0 %v140_v2  ;;  %341 = vmatpush.xpose.msra.mxu1 %v141_v3  ;;  %v138_v6 = vld [vmem:[%s1907_s1 + $0xe0] sm:$0xff]  ;;  %v139_v7 = vld [vmem:[%s1907_s1 + $0xe8] sm:$0xff]  ;;  %v168_v8 = vld [vmem:[%s1907_s1 + $0x1d0] sm:$0xff] }
   0x4   :  { %v169_v9 = vld [vmem:[%s1907_s1 + $0x1d8] sm:$0xff]  ;;  %v136_v10 = vld [vmem:[%s1907_s1 + $0xd0] sm:$0xff]  ;;  %v166_v12 = vld [vmem:[%s1907_s1 + $0x1c0] sm:$0xff] }
   0x5   :  { %v137_v11 = vld [vmem:[%s1907_s1 + $0xd8] sm:$0xff]  ;;  %v167_v13 = vld [vmem:[%s1907_s1 + $0x1c8] sm:$0xff]  ;;  %v134_v14 = vld [vmem:[%s1907_s1 + $0xc0] sm:$0xff] }
   0x6   :  { %503 = vmatpush.xpose.msra.mxu2 %v170_v4  ;;  %664 = vmatpush.xpose.msra.mxu3 %v171_v5  ;;  %v135_v15 = vld [vmem:[%s1907_s1 + $0xc8] sm:$0xff]  ;;  %v164_v16 = vld [vmem:[%s1907_s1 + $0x1b0] sm:$0xff]  ;;  %v165_v17 = vld [vmem:[%s1907_s1 + $0x1b8] sm:$0xff] }
   0x7   :  { %181 = vmatpush.xpose.msra.mxu0 %v138_v6  ;;  %342 = vmatpush.xpose.msra.mxu1 %v139_v7  ;;  %v132_v18 = vld [vmem:[%s1907_s1 + $0xb0] sm:$0xff]  ;;  %v133_v19 = vld [vmem:[%s1907_s1 + $0xb8] sm:$0xff]  ;;  %v162_v20 = vld [vmem:[%s1907_s1 + $0x1a0] sm:$0xff] }
   0x8   :  { %v163_v21 = vld [vmem:[%s1907_s1 + $0x1a8] sm:$0xff]  ;;  %v130_v22 = vld [vmem:[%s1907_s1 + $0xa0] sm:$0xff]  ;;  %v160_v24 = vld [vmem:[%s1907_s1 + $0x190] sm:$0xff] }
   0x9   :  { %v131_v23 = vld [vmem:[%s1907_s1 + $0xa8] sm:$0xff]  ;;  %v161_v25 = vld [vmem:[%s1907_s1 + $0x198] sm:$0xff]  ;;  %v128_v26 = vld [vmem:[%s1907_s1 + $0x90] sm:$0xff] }
   0xa   :  { %504 = vmatpush.xpose.msra.mxu2 %v168_v8  ;;  %665 = vmatpush.xpose.msra.mxu3 %v169_v9  ;;  %v129_v27 = vld [vmem:[%s1907_s1 + $0x98] sm:$0xff]  ;;  %v158_v28 = vld [vmem:[%s1907_s1 + $0x180] sm:$0xff]  ;;  %v159_v29 = vld [vmem:[%s1907_s1 + $0x188] sm:$0xff] }
   0xb   :  { %182 = vmatpush.xpose.msra.mxu0 %v136_v10  ;;  %343 = vmatpush.xpose.msra.mxu1 %v137_v11  ;;  %v126_v30 = vld [vmem:[%s1907_s1 + $0x80] sm:$0xff]  ;;  %v127_v31 = vld [vmem:[%s1907_s1 + $0x88] sm:$0xff]  ;;  %v156_v32 = vld [vmem:[%s1907_s1 + $0x170] sm:$0xff] }
   0xc   :  { %v157_v33 = vld [vmem:[%s1907_s1 + $0x178] sm:$0xff]  ;;  %v124_v34 = vld [vmem:[%s1907_s1 + $0x70] sm:$0xff]  ;;  %v154_v36 = vld [vmem:[%s1907_s1 + $0x160] sm:$0xff] }
   0xd   :  { %v125_v35 = vld [vmem:[%s1907_s1 + $0x78] sm:$0xff]  ;;  %v155_v37 = vld [vmem:[%s1907_s1 + $0x168] sm:$0xff]  ;;  %v122_v38 = vld [vmem:[%s1907_s1 + $0x60] sm:$0xff] }
   0xe   :  { %505 = vmatpush.xpose.msra.mxu2 %v166_v12  ;;  %666 = vmatpush.xpose.msra.mxu3 %v167_v13  ;;  %v123_v39 = vld [vmem:[%s1907_s1 + $0x68] sm:$0xff]  ;;  %v152_v40 = vld [vmem:[%s1907_s1 + $0x150] sm:$0xff]  ;;  %v153_v41 = vld [vmem:[%s1907_s1 + $0x158] sm:$0xff] }
   0xf   :  { %183 = vmatpush.xpose.msra.mxu0 %v134_v14  ;;  %344 = vmatpush.xpose.msra.mxu1 %v135_v15  ;;  %v120_v42 = vld [vmem:[%s1907_s1 + $0x50] sm:$0xff]  ;;  %v121_v43 = vld [vmem:[%s1907_s1 + $0x58] sm:$0xff]  ;;  %v150_v44 = vld [vmem:[%s1907_s1 + $0x140] sm:$0xff] }
  0x10   :  { %v151_v45 = vld [vmem:[%s1907_s1 + $0x148] sm:$0xff]  ;;  %v118_v46 = vld [vmem:[%s1907_s1 + $0x40] sm:$0xff]  ;;  %v148_v48 = vld [vmem:[%s1907_s1 + $0x130] sm:$0xff] }
  0x11   :  { %v119_v47 = vld [vmem:[%s1907_s1 + $0x48] sm:$0xff]  ;;  %v149_v49 = vld [vmem:[%s1907_s1 + $0x138] sm:$0xff]  ;;  %v116_v50 = vld [vmem:[%s1907_s1 + $0x30] sm:$0xff] }
  0x12   :  { %506 = vmatpush.xpose.msra.mxu2 %v164_v16  ;;  %667 = vmatpush.xpose.msra.mxu3 %v165_v17  ;;  %v117_v51 = vld [vmem:[%s1907_s1 + $0x38] sm:$0xff]  ;;  %v146_v52 = vld [vmem:[%s1907_s1 + $0x120] sm:$0xff]  ;;  %v147_v53 = vld [vmem:[%s1907_s1 + $0x128] sm:$0xff] }
  0x13   :  { %184 = vmatpush.xpose.msra.mxu0 %v132_v18  ;;  %345 = vmatpush.xpose.msra.mxu1 %v133_v19  ;;  %v114_v54 = vld [vmem:[%s1907_s1 + $0x20] sm:$0xff]  ;;  %v115_v55 = vld [vmem:[%s1907_s1 + $0x28] sm:$0xff]  ;;  %v144_v56 = vld [vmem:[%s1907_s1 + $0x110] sm:$0xff] }
  0x14   :  { %v145_v57 = vld [vmem:[%s1907_s1 + $0x118] sm:$0xff]  ;;  %v112_v58 = vld [vmem:[%s1907_s1 + $0x10] sm:$0xff]  ;;  %v142_v60 = vld [vmem:[%s1907_s1 + $0x100] sm:$0xff] }
  0x15   :  { %v113_v59 = vld [vmem:[%s1907_s1 + $0x18] sm:$0xff]  ;;  %v143_v61 = vld [vmem:[%s1907_s1 + $0x108] sm:$0xff]  ;;  %v110_v62 = vld [vmem:[%s1907_s1] sm:$0xff] }
  0x16   :  { %507 = vmatpush.xpose.msra.mxu2 %v162_v20  ;;  %668 = vmatpush.xpose.msra.mxu3 %v163_v21  ;;  %v111_v63 = vld [vmem:[%s1907_s1 + $0x8] sm:$0xff]  ;;  %v14_v0 = vld [vmem:[%s1906_s0] sm:$0xff]  ;;  %v16_v2 = vld [vmem:[%s1906_s0 + $0x10] sm:$0xff] }
  0x17   :  { %185 = vmatpush.xpose.msra.mxu0 %v130_v22  ;;  %346 = vmatpush.xpose.msra.mxu1 %v131_v23  ;;  %v15_v1 = vld [vmem:[%s1906_s0 + $0x8] sm:$0xff]  ;;  %v17_v3 = vld [vmem:[%s1906_s0 + $0x18] sm:$0xff]  ;;  %v18_v4 = vld [vmem:[%s1906_s0 + $0x20] sm:$0xff] }
  0x18   :  { %v19_v5 = vld [vmem:[%s1906_s0 + $0x28] sm:$0xff]  ;;  %v20_v6 = vld [vmem:[%s1906_s0 + $0x30] sm:$0xff]  ;;  %v21_v7 = vld [vmem:[%s1906_s0 + $0x38] sm:$0xff] }
  0x19   :  { %v22_v8 = vld [vmem:[%s1906_s0 + $0x40] sm:$0xff]  ;;  %v23_v9 = vld [vmem:[%s1906_s0 + $0x48] sm:$0xff]  ;;  %v24_v10 = vld [vmem:[%s1906_s0 + $0x50] sm:$0xff] }
  0x1a   :  { %508 = vmatpush.xpose.msra.mxu2 %v160_v24  ;;  %669 = vmatpush.xpose.msra.mxu3 %v161_v25  ;;  %v25_v11 = vld [vmem:[%s1906_s0 + $0x58] sm:$0xff]  ;;  %v26_v12 = vld [vmem:[%s1906_s0 + $0x60] sm:$0xff]  ;;  %v27_v13 = vld [vmem:[%s1906_s0 + $0x68] sm:$0xff] }
  0x1b   :  { %186 = vmatpush.xpose.msra.mxu0 %v128_v26  ;;  %347 = vmatpush.xpose.msra.mxu1 %v129_v27  ;;  %v28_v14 = vld [vmem:[%s1906_s0 + $0x70] sm:$0xff]  ;;  %v29_v15 = vld [vmem:[%s1906_s0 + $0x78] sm:$0xff]  ;;  %v30_v16 = vld [vmem:[%s1906_s0 + $0x80] sm:$0xff] }
  0x1c   :  { %v31_v17 = vld [vmem:[%s1906_s0 + $0x88] sm:$0xff]  ;;  %v32_v18 = vld [vmem:[%s1906_s0 + $0x90] sm:$0xff]  ;;  %v33_v19 = vld [vmem:[%s1906_s0 + $0x98] sm:$0xff] }
  0x1d   :  { %v34_v20 = vld [vmem:[%s1906_s0 + $0xa0] sm:$0xff]  ;;  %v35_v21 = vld [vmem:[%s1906_s0 + $0xa8] sm:$0xff]  ;;  %v36_v22 = vld [vmem:[%s1906_s0 + $0xb0] sm:$0xff] }
  0x1e   :  { %509 = vmatpush.xpose.msra.mxu2 %v158_v28  ;;  %670 = vmatpush.xpose.msra.mxu3 %v159_v29  ;;  %v37_v23 = vld [vmem:[%s1906_s0 + $0xb8] sm:$0xff]  ;;  %v38_v24 = vld [vmem:[%s1906_s0 + $0xc0] sm:$0xff]  ;;  %v39_v25 = vld [vmem:[%s1906_s0 + $0xc8] sm:$0xff] }
  0x1f   :  { %187 = vmatpush.xpose.msra.mxu0 %v126_v30  ;;  %348 = vmatpush.xpose.msra.mxu1 %v127_v31  ;;  %v40_v26 = vld [vmem:[%s1906_s0 + $0xd0] sm:$0xff]  ;;  %v41_v27 = vld [vmem:[%s1906_s0 + $0xd8] sm:$0xff]  ;;  %v42_v28 = vld [vmem:[%s1906_s0 + $0xe0] sm:$0xff] }
  0x20   :  { %v43_v29 = vld [vmem:[%s1906_s0 + $0xe8] sm:$0xff]  ;;  %v44_v30 = vld [vmem:[%s1906_s0 + $0xf0] sm:$0xff]  ;;  %v45_v31 = vld [vmem:[%s1906_s0 + $0xf8] sm:$0xff] }
  0x22   :  { %510 = vmatpush.xpose.msra.mxu2 %v156_v32  ;;  %671 = vmatpush.xpose.msra.mxu3 %v157_v33  ;;  %v174_v32 = vld [vmem:[%s1908_s2] sm:$0x3] }
  0x23   :  { %188 = vmatpush.xpose.msra.mxu0 %v124_v34  ;;  %349 = vmatpush.xpose.msra.mxu1 %v125_v35  ;;  %v1406_v33 = vperm.slane %v174_v32, 0  ;;  %v46_v34 = vld [vmem:[%s1906_s0 + $0x100] sm:$0xff]  ;;  %v47_v35 = vld [vmem:[%s1906_s0 + $0x108] sm:$0xff] }
  0x26   :  { %511 = vmatpush.xpose.msra.mxu2 %v154_v36  ;;  %672 = vmatpush.xpose.msra.mxu3 %v155_v37 }
  0x27   :  { %189 = vmatpush.xpose.msra.mxu0 %v122_v38  ;;  %350 = vmatpush.xpose.msra.mxu1 %v123_v39  ;;  %v1415_v39 = vperm.slane %v174_v32, 1 }
  0x2a   :  { %512 = vmatpush.xpose.msra.mxu2 %v152_v40  ;;  %673 = vmatpush.xpose.msra.mxu3 %v153_v41 }
  0x2b   :  { %190 = vmatpush.xpose.msra.mxu0 %v120_v42  ;;  %351 = vmatpush.xpose.msra.mxu1 %v121_v43 }
  0x2e   :  { %513 = vmatpush.xpose.msra.mxu2 %v150_v44  ;;  %674 = vmatpush.xpose.msra.mxu3 %v151_v45  ;;  %v48_v44 = vld [vmem:[%s1906_s0 + $0x110] sm:$0xff]  ;;  %v49_v45 = vld [vmem:[%s1906_s0 + $0x118] sm:$0xff] }
  0x2f   :  { %191 = vmatpush.xpose.msra.mxu0 %v118_v46  ;;  %352 = vmatpush.xpose.msra.mxu1 %v119_v47 }
  0x32   :  { %514 = vmatpush.xpose.msra.mxu2 %v148_v48  ;;  %675 = vmatpush.xpose.msra.mxu3 %v149_v49 }
  0x33   :  { %192 = vmatpush.xpose.msra.mxu0 %v116_v50  ;;  %353 = vmatpush.xpose.msra.mxu1 %v117_v51 }
  0x36   :  { %515 = vmatpush.xpose.msra.mxu2 %v146_v52  ;;  %676 = vmatpush.xpose.msra.mxu3 %v147_v53 }
  0x37   :  { %193 = vmatpush.xpose.msra.mxu0 %v114_v54  ;;  %354 = vmatpush.xpose.msra.mxu1 %v115_v55  ;;  %v50_v54 = vld [vmem:[%s1906_s0 + $0x120] sm:$0xff]  ;;  %v51_v55 = vld [vmem:[%s1906_s0 + $0x128] sm:$0xff] }
  0x3a   :  { %516 = vmatpush.xpose.msra.mxu2 %v144_v56  ;;  %677 = vmatpush.xpose.msra.mxu3 %v145_v57 }
  0x3b   :  { %194 = vmatpush.xpose.msra.mxu0 %v112_v58  ;;  %355 = vmatpush.xpose.msra.mxu1 %v113_v59 }
  0x3e   :  { %517 = vmatpush.xpose.msra.mxu2 %v142_v60  ;;  %678 = vmatpush.xpose.msra.mxu3 %v143_v61 }
  0x3f   :  { %195 = vmatpush.xpose.msra.mxu0 %v110_v62  ;;  %356 = vmatpush.xpose.msra.mxu1 %v111_v63 }
  0x41   :  { %518 = vmatmul.f32.vlgmr.msra.gmra.mxu2 %v14_v0  ;;  %679 = vmatmul.f32.vlgmr.msra.gmra.mxu3 %v15_v1 }
  0x42   :  { %196 = vmatmul.f32.vlgmr.msra.gmra.mxu0 %v14_v0  ;;  %357 = vmatmul.f32.vlgmr.msra.gmra.mxu1 %v15_v1  ;;  %v52_v0 = vld [vmem:[%s1906_s0 + $0x130] sm:$0xff]  ;;  %v53_v1 = vld [vmem:[%s1906_s0 + $0x138] sm:$0xff] }
  0x49   :  { %521 = vmatmul.f32.gmra.mxu2 %v16_v2  ;;  %682 = vmatmul.f32.gmra.mxu3 %v17_v3 }
  0x4a   :  { %199 = vmatmul.f32.gmra.mxu0 %v16_v2  ;;  %360 = vmatmul.f32.gmra.mxu1 %v17_v3 }
  0x51   :  { %524 = vmatmul.f32.gmra.mxu2 %v18_v4  ;;  %685 = vmatmul.f32.gmra.mxu3 %v19_v5 }
  0x52   :  { %202 = vmatmul.f32.gmra.mxu0 %v18_v4  ;;  %363 = vmatmul.f32.gmra.mxu1 %v19_v5 }
  0x59   :  { %527 = vmatmul.f32.gmra.mxu2 %v20_v6  ;;  %688 = vmatmul.f32.gmra.mxu3 %v21_v7 }
  0x5a   :  { %205 = vmatmul.f32.gmra.mxu0 %v20_v6  ;;  %366 = vmatmul.f32.gmra.mxu1 %v21_v7 }
  0x61   :  { %530 = vmatmul.f32.gmra.mxu2 %v22_v8  ;;  %691 = vmatmul.f32.gmra.mxu3 %v23_v9 }
  0x62   :  { %208 = vmatmul.f32.gmra.mxu0 %v22_v8  ;;  %369 = vmatmul.f32.gmra.mxu1 %v23_v9 }
  0x69   :  { %533 = vmatmul.f32.gmra.mxu2 %v24_v10  ;;  %694 = vmatmul.f32.gmra.mxu3 %v25_v11 }
  0x6a   :  { %211 = vmatmul.f32.gmra.mxu0 %v24_v10  ;;  %372 = vmatmul.f32.gmra.mxu1 %v25_v11  ;;  %v54_v10 = vld [vmem:[%s1906_s0 + $0x140] sm:$0xff]  ;;  %v55_v11 = vld [vmem:[%s1906_s0 + $0x148] sm:$0xff] }
  0x71   :  { %536 = vmatmul.f32.gmra.mxu2 %v26_v12  ;;  %697 = vmatmul.f32.gmra.mxu3 %v27_v13 }
  0x72   :  { %214 = vmatmul.f32.gmra.mxu0 %v26_v12  ;;  %375 = vmatmul.f32.gmra.mxu1 %v27_v13 }
  0x79   :  { %539 = vmatmul.f32.gmra.mxu2 %v28_v14  ;;  %700 = vmatmul.f32.gmra.mxu3 %v29_v15 }
  0x7a   :  { %217 = vmatmul.f32.gmra.mxu0 %v28_v14  ;;  %378 = vmatmul.f32.gmra.mxu1 %v29_v15 }
  0x81   :  { %542 = vmatmul.f32.gmra.mxu2 %v30_v16  ;;  %703 = vmatmul.f32.gmra.mxu3 %v31_v17 }
  0x82   :  { %220 = vmatmul.f32.gmra.mxu0 %v30_v16  ;;  %381 = vmatmul.f32.gmra.mxu1 %v31_v17 }
  0x89   :  { %545 = vmatmul.f32.gmra.mxu2 %v32_v18  ;;  %706 = vmatmul.f32.gmra.mxu3 %v33_v19 }
  0x8a   :  { %223 = vmatmul.f32.gmra.mxu0 %v32_v18  ;;  %384 = vmatmul.f32.gmra.mxu1 %v33_v19 }
  0x91   :  { %548 = vmatmul.f32.gmra.mxu2 %v34_v20  ;;  %709 = vmatmul.f32.gmra.mxu3 %v35_v21 }
  0x92   :  { %226 = vmatmul.f32.gmra.mxu0 %v34_v20  ;;  %387 = vmatmul.f32.gmra.mxu1 %v35_v21  ;;  %v56_v20 = vld [vmem:[%s1906_s0 + $0x150] sm:$0xff]  ;;  %v57_v21 = vld [vmem:[%s1906_s0 + $0x158] sm:$0xff] }
  0x99   :  { %551 = vmatmul.f32.gmra.mxu2 %v36_v22  ;;  %712 = vmatmul.f32.gmra.mxu3 %v37_v23 }
  0x9a   :  { %229 = vmatmul.f32.gmra.mxu0 %v36_v22  ;;  %390 = vmatmul.f32.gmra.mxu1 %v37_v23 }
  0xa1   :  { %554 = vmatmul.f32.gmra.mxu2 %v38_v24  ;;  %715 = vmatmul.f32.gmra.mxu3 %v39_v25 }
  0xa2   :  { %232 = vmatmul.f32.gmra.mxu0 %v38_v24  ;;  %393 = vmatmul.f32.gmra.mxu1 %v39_v25 }
  0xa9   :  { %557 = vmatmul.f32.gmra.mxu2 %v40_v26  ;;  %718 = vmatmul.f32.gmra.mxu3 %v41_v27 }
  0xaa   :  { %235 = vmatmul.f32.gmra.mxu0 %v40_v26  ;;  %396 = vmatmul.f32.gmra.mxu1 %v41_v27 }
  0xb1   :  { %560 = vmatmul.f32.gmra.mxu2 %v42_v28  ;;  %721 = vmatmul.f32.gmra.mxu3 %v43_v29 }
  0xb2   :  { %238 = vmatmul.f32.gmra.mxu0 %v42_v28  ;;  %399 = vmatmul.f32.gmra.mxu1 %v43_v29 }
  0xb9   :  { %563 = vmatmul.f32.gmra.mxu2 %v44_v30  ;;  %724 = vmatmul.f32.gmra.mxu3 %v45_v31 }
  0xba   :  { %241 = vmatmul.f32.gmra.mxu0 %v44_v30  ;;  %402 = vmatmul.f32.gmra.mxu1 %v45_v31  ;;  %v58_v30 = vld [vmem:[%s1906_s0 + $0x160] sm:$0xff]  ;;  %v59_v31 = vld [vmem:[%s1906_s0 + $0x168] sm:$0xff] }
  0xbf   :  { %v197_v36 = vpop.f32.mrf.mxu0  ;;  %v358_v37 = vpop.f32.mrf.mxu1 }
  0xc0   :  { %v198_v38 = vadd.f32 %v197_v36, %v1406_v33 }
  0xc1   :  { %566 = vmatmul.f32.gmra.mxu2 %v46_v34  ;;  %727 = vmatmul.f32.gmra.mxu3 %v47_v35 }
  0xc2   :  { %v359_v40 = vadd.f32 %v358_v37, %v198_v38  ;;  %244 = vmatmul.f32.gmra.mxu0 %v46_v34  ;;  %405 = vmatmul.f32.gmra.mxu1 %v47_v35 }
  0xc4   :  { %935 = vst [vmem:[%s1909_s3] sm:$0xff] %v359_v40  ;;  %v519_v41 = vpop.f32.mrf.mxu2  ;;  %v680_v42 = vpop.f32.mrf.mxu3 }
  0xc5   :  { %v520_v43 = vadd.f32 %v519_v41, %v1415_v39 }
  0xc7   :  { %v681_v46 = vadd.f32 %v680_v42, %v520_v43  ;;  %v200_v47 = vpop.f32.mrf.mxu0  ;;  %v361_v48 = vpop.f32.mrf.mxu1  ;;  %v60_v42 = vld [vmem:[%s1906_s0 + $0x170] sm:$0xff]  ;;  %v61_v43 = vld [vmem:[%s1906_s0 + $0x178] sm:$0xff] }
  0xc8   :  { %v201_v49 = vadd.f32 %v200_v47, %v1406_v33 }
  0xc9   :  { %937 = vst [vmem:[%s1909_s3 + $0x8] sm:$0xff] %v681_v46  ;;  %569 = vmatmul.f32.gmra.mxu2 %v48_v44  ;;  %730 = vmatmul.f32.gmra.mxu3 %v49_v45 }
  0xca   :  { %v362_v50 = vadd.f32 %v361_v48, %v201_v49  ;;  %247 = vmatmul.f32.gmra.mxu0 %v48_v44  ;;  %408 = vmatmul.f32.gmra.mxu1 %v49_v45 }
  0xcc   :  { %939 = vst [vmem:[%s1909_s3 + $0x10] sm:$0xff] %v362_v50  ;;  %v522_v51 = vpop.f32.mrf.mxu2  ;;  %v683_v52 = vpop.f32.mrf.mxu3 }
  0xcd   :  { %v523_v53 = vadd.f32 %v522_v51, %v1415_v39 }
  0xcf   :  { %v684_v56 = vadd.f32 %v683_v52, %v523_v53  ;;  %v203_v57 = vpop.f32.mrf.mxu0  ;;  %v364_v58 = vpop.f32.mrf.mxu1  ;;  %v62_v52 = vld [vmem:[%s1906_s0 + $0x180] sm:$0xff]  ;;  %v63_v53 = vld [vmem:[%s1906_s0 + $0x188] sm:$0xff] }
  0xd0   :  { %v204_v59 = vadd.f32 %v203_v57, %v1406_v33 }
  0xd1   :  { %941 = vst [vmem:[%s1909_s3 + $0x18] sm:$0xff] %v684_v56  ;;  %572 = vmatmul.f32.gmra.mxu2 %v50_v54  ;;  %733 = vmatmul.f32.gmra.mxu3 %v51_v55 }
  0xd2   :  { %v365_v60 = vadd.f32 %v364_v58, %v204_v59  ;;  %250 = vmatmul.f32.gmra.mxu0 %v50_v54  ;;  %411 = vmatmul.f32.gmra.mxu1 %v51_v55 }
  0xd4   :  { %943 = vst [vmem:[%s1909_s3 + $0x20] sm:$0xff] %v365_v60  ;;  %v525_v61 = vpop.f32.mrf.mxu2  ;;  %v686_v62 = vpop.f32.mrf.mxu3 }
  0xd5   :  { %v526_v63 = vadd.f32 %v525_v61, %v1415_v39 }
  0xd7   :  { %v687_v2 = vadd.f32 %v686_v62, %v526_v63  ;;  %v206_v3 = vpop.f32.mrf.mxu0  ;;  %v367_v4 = vpop.f32.mrf.mxu1  ;;  %v64_v62 = vld [vmem:[%s1906_s0 + $0x190] sm:$0xff]  ;;  %v65_v63 = vld [vmem:[%s1906_s0 + $0x198] sm:$0xff] }
  0xd8   :  { %v207_v5 = vadd.f32 %v206_v3, %v1406_v33 }
  0xd9   :  { %945 = vst [vmem:[%s1909_s3 + $0x28] sm:$0xff] %v687_v2  ;;  %575 = vmatmul.f32.gmra.mxu2 %v52_v0  ;;  %736 = vmatmul.f32.gmra.mxu3 %v53_v1 }
  0xda   :  { %v368_v6 = vadd.f32 %v367_v4, %v207_v5  ;;  %253 = vmatmul.f32.gmra.mxu0 %v52_v0  ;;  %414 = vmatmul.f32.gmra.mxu1 %v53_v1 }
  0xdc   :  { %947 = vst [vmem:[%s1909_s3 + $0x30] sm:$0xff] %v368_v6  ;;  %v528_v7 = vpop.f32.mrf.mxu2  ;;  %v689_v8 = vpop.f32.mrf.mxu3 }
  0xdd   :  { %v529_v9 = vadd.f32 %v528_v7, %v1415_v39 }
  0xdf   :  { %v690_v12 = vadd.f32 %v689_v8, %v529_v9  ;;  %v209_v13 = vpop.f32.mrf.mxu0  ;;  %v370_v14 = vpop.f32.mrf.mxu1  ;;  %v66_v8 = vld [vmem:[%s1906_s0 + $0x1a0] sm:$0xff]  ;;  %v67_v9 = vld [vmem:[%s1906_s0 + $0x1a8] sm:$0xff] }
  0xe0   :  { %v210_v15 = vadd.f32 %v209_v13, %v1406_v33 }
  0xe1   :  { %949 = vst [vmem:[%s1909_s3 + $0x38] sm:$0xff] %v690_v12  ;;  %578 = vmatmul.f32.gmra.mxu2 %v54_v10  ;;  %739 = vmatmul.f32.gmra.mxu3 %v55_v11 }
  0xe2   :  { %v371_v16 = vadd.f32 %v370_v14, %v210_v15  ;;  %256 = vmatmul.f32.gmra.mxu0 %v54_v10  ;;  %417 = vmatmul.f32.gmra.mxu1 %v55_v11 }
  0xe4   :  { %951 = vst [vmem:[%s1909_s3 + $0x40] sm:$0xff] %v371_v16  ;;  %v531_v17 = vpop.f32.mrf.mxu2  ;;  %v692_v18 = vpop.f32.mrf.mxu3 }
  0xe5   :  { %v532_v19 = vadd.f32 %v531_v17, %v1415_v39 }
  0xe7   :  { %v693_v22 = vadd.f32 %v692_v18, %v532_v19  ;;  %v212_v23 = vpop.f32.mrf.mxu0  ;;  %v373_v24 = vpop.f32.mrf.mxu1  ;;  %v68_v18 = vld [vmem:[%s1906_s0 + $0x1b0] sm:$0xff]  ;;  %v69_v19 = vld [vmem:[%s1906_s0 + $0x1b8] sm:$0xff] }
  0xe8   :  { %v213_v25 = vadd.f32 %v212_v23, %v1406_v33 }
  0xe9   :  { %953 = vst [vmem:[%s1909_s3 + $0x48] sm:$0xff] %v693_v22  ;;  %581 = vmatmul.f32.gmra.mxu2 %v56_v20  ;;  %742 = vmatmul.f32.gmra.mxu3 %v57_v21 }
  0xea   :  { %v374_v26 = vadd.f32 %v373_v24, %v213_v25  ;;  %259 = vmatmul.f32.gmra.mxu0 %v56_v20  ;;  %420 = vmatmul.f32.gmra.mxu1 %v57_v21 }
  0xec   :  { %955 = vst [vmem:[%s1909_s3 + $0x50] sm:$0xff] %v374_v26  ;;  %v534_v27 = vpop.f32.mrf.mxu2  ;;  %v695_v28 = vpop.f32.mrf.mxu3 }
  0xed   :  { %v535_v29 = vadd.f32 %v534_v27, %v1415_v39 }
  0xef   :  { %v696_v32 = vadd.f32 %v695_v28, %v535_v29  ;;  %v215_v34 = vpop.f32.mrf.mxu0  ;;  %v376_v35 = vpop.f32.mrf.mxu1  ;;  %v70_v28 = vld [vmem:[%s1906_s0 + $0x1c0] sm:$0xff]  ;;  %v71_v29 = vld [vmem:[%s1906_s0 + $0x1c8] sm:$0xff] }
  0xf0   :  { %v216_v36 = vadd.f32 %v215_v34, %v1406_v33 }
  0xf1   :  { %957 = vst [vmem:[%s1909_s3 + $0x58] sm:$0xff] %v696_v32  ;;  %584 = vmatmul.f32.gmra.mxu2 %v58_v30  ;;  %745 = vmatmul.f32.gmra.mxu3 %v59_v31 }
  0xf2   :  { %v377_v37 = vadd.f32 %v376_v35, %v216_v36  ;;  %262 = vmatmul.f32.gmra.mxu0 %v58_v30  ;;  %423 = vmatmul.f32.gmra.mxu1 %v59_v31 }
  0xf4   :  { %959 = vst [vmem:[%s1909_s3 + $0x60] sm:$0xff] %v377_v37  ;;  %v537_v38 = vpop.f32.mrf.mxu2  ;;  %v698_v40 = vpop.f32.mrf.mxu3 }
  0xf5   :  { %v538_v41 = vadd.f32 %v537_v38, %v1415_v39 }
  0xf7   :  { %v699_v44 = vadd.f32 %v698_v40, %v538_v41  ;;  %v218_v45 = vpop.f32.mrf.mxu0  ;;  %v379_v46 = vpop.f32.mrf.mxu1  ;;  %v72_v40 = vld [vmem:[%s1906_s0 + $0x1d0] sm:$0xff]  ;;  %v73_v41 = vld [vmem:[%s1906_s0 + $0x1d8] sm:$0xff] }
  0xf8   :  { %v219_v47 = vadd.f32 %v218_v45, %v1406_v33 }
  0xf9   :  { %961 = vst [vmem:[%s1909_s3 + $0x68] sm:$0xff] %v699_v44  ;;  %587 = vmatmul.f32.gmra.mxu2 %v60_v42  ;;  %748 = vmatmul.f32.gmra.mxu3 %v61_v43 }
  0xfa   :  { %v380_v48 = vadd.f32 %v379_v46, %v219_v47  ;;  %265 = vmatmul.f32.gmra.mxu0 %v60_v42  ;;  %426 = vmatmul.f32.gmra.mxu1 %v61_v43 }
  0xfc   :  { %963 = vst [vmem:[%s1909_s3 + $0x70] sm:$0xff] %v380_v48  ;;  %v540_v49 = vpop.f32.mrf.mxu2  ;;  %v701_v50 = vpop.f32.mrf.mxu3 }
  0xfd   :  { %v541_v51 = vadd.f32 %v540_v49, %v1415_v39 }
  0xff   :  { %v702_v54 = vadd.f32 %v701_v50, %v541_v51  ;;  %v221_v55 = vpop.f32.mrf.mxu0  ;;  %v382_v56 = vpop.f32.mrf.mxu1  ;;  %v74_v50 = vld [vmem:[%s1906_s0 + $0x1e0] sm:$0xff]  ;;  %v75_v51 = vld [vmem:[%s1906_s0 + $0x1e8] sm:$0xff] }
 0x100   :  { %v222_v57 = vadd.f32 %v221_v55, %v1406_v33 }
 0x101   :  { %965 = vst [vmem:[%s1909_s3 + $0x78] sm:$0xff] %v702_v54  ;;  %590 = vmatmul.f32.gmra.mxu2 %v62_v52  ;;  %751 = vmatmul.f32.gmra.mxu3 %v63_v53 }
 0x102   :  { %v383_v58 = vadd.f32 %v382_v56, %v222_v57  ;;  %268 = vmatmul.f32.gmra.mxu0 %v62_v52  ;;  %429 = vmatmul.f32.gmra.mxu1 %v63_v53 }
 0x104   :  { %967 = vst [vmem:[%s1909_s3 + $0x80] sm:$0xff] %v383_v58  ;;  %v543_v59 = vpop.f32.mrf.mxu2  ;;  %v704_v60 = vpop.f32.mrf.mxu3 }
 0x105   :  { %v544_v61 = vadd.f32 %v543_v59, %v1415_v39 }
 0x107   :  { %v705_v0 = vadd.f32 %v704_v60, %v544_v61  ;;  %v224_v1 = vpop.f32.mrf.mxu0  ;;  %v385_v2 = vpop.f32.mrf.mxu1  ;;  %v76_v60 = vld [vmem:[%s1906_s0 + $0x1f0] sm:$0xff]  ;;  %v77_v61 = vld [vmem:[%s1906_s0 + $0x1f8] sm:$0xff] }
 0x108   :  { %v225_v3 = vadd.f32 %v224_v1, %v1406_v33 }
 0x109   :  { %969 = vst [vmem:[%s1909_s3 + $0x88] sm:$0xff] %v705_v0  ;;  %593 = vmatmul.f32.gmra.mxu2 %v64_v62  ;;  %754 = vmatmul.f32.gmra.mxu3 %v65_v63 }
 0x10a   :  { %v386_v4 = vadd.f32 %v385_v2, %v225_v3  ;;  %271 = vmatmul.f32.gmra.mxu0 %v64_v62  ;;  %432 = vmatmul.f32.gmra.mxu1 %v65_v63 }
 0x10c   :  { %971 = vst [vmem:[%s1909_s3 + $0x90] sm:$0xff] %v386_v4  ;;  %v546_v5 = vpop.f32.mrf.mxu2  ;;  %v707_v6 = vpop.f32.mrf.mxu3 }
 0x10d   :  { %v547_v7 = vadd.f32 %v546_v5, %v1415_v39 }
 0x10f   :  { %v708_v10 = vadd.f32 %v707_v6, %v547_v7  ;;  %v227_v11 = vpop.f32.mrf.mxu0  ;;  %v388_v12 = vpop.f32.mrf.mxu1  ;;  %v78_v6 = vld [vmem:[%s1906_s0 + $0x200] sm:$0xff]  ;;  %v79_v7 = vld [vmem:[%s1906_s0 + $0x208] sm:$0xff] }
 0x110   :  { %v228_v13 = vadd.f32 %v227_v11, %v1406_v33 }
 0x111   :  { %973 = vst [vmem:[%s1909_s3 + $0x98] sm:$0xff] %v708_v10  ;;  %596 = vmatmul.f32.gmra.mxu2 %v66_v8  ;;  %757 = vmatmul.f32.gmra.mxu3 %v67_v9 }
 0x112   :  { %v389_v14 = vadd.f32 %v388_v12, %v228_v13  ;;  %274 = vmatmul.f32.gmra.mxu0 %v66_v8  ;;  %435 = vmatmul.f32.gmra.mxu1 %v67_v9 }
 0x114   :  { %975 = vst [vmem:[%s1909_s3 + $0xa0] sm:$0xff] %v389_v14  ;;  %v549_v15 = vpop.f32.mrf.mxu2  ;;  %v710_v16 = vpop.f32.mrf.mxu3 }
 0x115   :  { %v550_v17 = vadd.f32 %v549_v15, %v1415_v39 }
 0x117   :  { %v711_v20 = vadd.f32 %v710_v16, %v550_v17  ;;  %v230_v21 = vpop.f32.mrf.mxu0  ;;  %v391_v22 = vpop.f32.mrf.mxu1  ;;  %v80_v16 = vld [vmem:[%s1906_s0 + $0x210] sm:$0xff]  ;;  %v81_v17 = vld [vmem:[%s1906_s0 + $0x218] sm:$0xff] }
 0x118   :  { %v231_v23 = vadd.f32 %v230_v21, %v1406_v33 }
 0x119   :  { %977 = vst [vmem:[%s1909_s3 + $0xa8] sm:$0xff] %v711_v20  ;;  %599 = vmatmul.f32.gmra.mxu2 %v68_v18  ;;  %760 = vmatmul.f32.gmra.mxu3 %v69_v19 }
 0x11a   :  { %v392_v24 = vadd.f32 %v391_v22, %v231_v23  ;;  %277 = vmatmul.f32.gmra.mxu0 %v68_v18  ;;  %438 = vmatmul.f32.gmra.mxu1 %v69_v19 }
 0x11c   :  { %979 = vst [vmem:[%s1909_s3 + $0xb0] sm:$0xff] %v392_v24  ;;  %v552_v25 = vpop.f32.mrf.mxu2  ;;  %v713_v26 = vpop.f32.mrf.mxu3 }
 0x11d   :  { %v553_v27 = vadd.f32 %v552_v25, %v1415_v39 }
 0x11f   :  { %v714_v30 = vadd.f32 %v713_v26, %v553_v27  ;;  %v233_v31 = vpop.f32.mrf.mxu0  ;;  %v394_v32 = vpop.f32.mrf.mxu1  ;;  %v82_v26 = vld [vmem:[%s1906_s0 + $0x220] sm:$0xff]  ;;  %v83_v27 = vld [vmem:[%s1906_s0 + $0x228] sm:$0xff] }
 0x120   :  { %v234_v34 = vadd.f32 %v233_v31, %v1406_v33 }
 0x121   :  { %981 = vst [vmem:[%s1909_s3 + $0xb8] sm:$0xff] %v714_v30  ;;  %602 = vmatmul.f32.gmra.mxu2 %v70_v28  ;;  %763 = vmatmul.f32.gmra.mxu3 %v71_v29 }
 0x122   :  { %v395_v35 = vadd.f32 %v394_v32, %v234_v34  ;;  %280 = vmatmul.f32.gmra.mxu0 %v70_v28  ;;  %441 = vmatmul.f32.gmra.mxu1 %v71_v29 }
 0x124   :  { %983 = vst [vmem:[%s1909_s3 + $0xc0] sm:$0xff] %v395_v35  ;;  %v555_v36 = vpop.f32.mrf.mxu2  ;;  %v716_v37 = vpop.f32.mrf.mxu3 }
 0x125   :  { %v556_v38 = vadd.f32 %v555_v36, %v1415_v39 }
 0x127   :  { %v717_v42 = vadd.f32 %v716_v37, %v556_v38  ;;  %v236_v43 = vpop.f32.mrf.mxu0  ;;  %v397_v44 = vpop.f32.mrf.mxu1  ;;  %v84_v37 = vld [vmem:[%s1906_s0 + $0x230] sm:$0xff]  ;;  %v85_v38 = vld [vmem:[%s1906_s0 + $0x238] sm:$0xff] }
 0x128   :  { %v237_v45 = vadd.f32 %v236_v43, %v1406_v33 }
 0x129   :  { %985 = vst [vmem:[%s1909_s3 + $0xc8] sm:$0xff] %v717_v42  ;;  %605 = vmatmul.f32.gmra.mxu2 %v72_v40  ;;  %766 = vmatmul.f32.gmra.mxu3 %v73_v41 }
 0x12a   :  { %v398_v46 = vadd.f32 %v397_v44, %v237_v45  ;;  %283 = vmatmul.f32.gmra.mxu0 %v72_v40  ;;  %444 = vmatmul.f32.gmra.mxu1 %v73_v41 }
 0x12c   :  { %987 = vst [vmem:[%s1909_s3 + $0xd0] sm:$0xff] %v398_v46  ;;  %v558_v47 = vpop.f32.mrf.mxu2  ;;  %v719_v48 = vpop.f32.mrf.mxu3 }
 0x12d   :  { %v559_v49 = vadd.f32 %v558_v47, %v1415_v39 }
 0x12f   :  { %v720_v52 = vadd.f32 %v719_v48, %v559_v49  ;;  %v239_v53 = vpop.f32.mrf.mxu0  ;;  %v400_v54 = vpop.f32.mrf.mxu1  ;;  %v86_v48 = vld [vmem:[%s1906_s0 + $0x240] sm:$0xff]  ;;  %v87_v49 = vld [vmem:[%s1906_s0 + $0x248] sm:$0xff] }
 0x130   :  { %v240_v55 = vadd.f32 %v239_v53, %v1406_v33 }
 0x131   :  { %989 = vst [vmem:[%s1909_s3 + $0xd8] sm:$0xff] %v720_v52  ;;  %608 = vmatmul.f32.gmra.mxu2 %v74_v50  ;;  %769 = vmatmul.f32.gmra.mxu3 %v75_v51 }
 0x132   :  { %v401_v56 = vadd.f32 %v400_v54, %v240_v55  ;;  %286 = vmatmul.f32.gmra.mxu0 %v74_v50  ;;  %447 = vmatmul.f32.gmra.mxu1 %v75_v51 }
 0x134   :  { %991 = vst [vmem:[%s1909_s3 + $0xe0] sm:$0xff] %v401_v56  ;;  %v561_v57 = vpop.f32.mrf.mxu2  ;;  %v722_v58 = vpop.f32.mrf.mxu3 }
 0x135   :  { %v562_v59 = vadd.f32 %v561_v57, %v1415_v39 }
 0x137   :  { %v723_v62 = vadd.f32 %v722_v58, %v562_v59  ;;  %v242_v63 = vpop.f32.mrf.mxu0  ;;  %v403_v0 = vpop.f32.mrf.mxu1  ;;  %v88_v58 = vld [vmem:[%s1906_s0 + $0x250] sm:$0xff]  ;;  %v89_v59 = vld [vmem:[%s1906_s0 + $0x258] sm:$0xff] }
 0x138   :  { %v243_v1 = vadd.f32 %v242_v63, %v1406_v33 }
 0x139   :  { %993 = vst [vmem:[%s1909_s3 + $0xe8] sm:$0xff] %v723_v62  ;;  %611 = vmatmul.f32.gmra.mxu2 %v76_v60  ;;  %772 = vmatmul.f32.gmra.mxu3 %v77_v61 }
 0x13a   :  { %v404_v2 = vadd.f32 %v403_v0, %v243_v1  ;;  %289 = vmatmul.f32.gmra.mxu0 %v76_v60  ;;  %450 = vmatmul.f32.gmra.mxu1 %v77_v61 }
 0x13c   :  { %995 = vst [vmem:[%s1909_s3 + $0xf0] sm:$0xff] %v404_v2  ;;  %v564_v3 = vpop.f32.mrf.mxu2  ;;  %v725_v4 = vpop.f32.mrf.mxu3 }
 0x13d   :  { %v565_v5 = vadd.f32 %v564_v3, %v1415_v39 }
 0x13f   :  { %v726_v8 = vadd.f32 %v725_v4, %v565_v5  ;;  %v245_v9 = vpop.f32.mrf.mxu0  ;;  %v406_v10 = vpop.f32.mrf.mxu1  ;;  %v90_v4 = vld [vmem:[%s1906_s0 + $0x260] sm:$0xff]  ;;  %v91_v5 = vld [vmem:[%s1906_s0 + $0x268] sm:$0xff] }
 0x140   :  { %v246_v11 = vadd.f32 %v245_v9, %v1406_v33 }
 0x141   :  { %997 = vst [vmem:[%s1909_s3 + $0xf8] sm:$0xff] %v726_v8  ;;  %614 = vmatmul.f32.gmra.mxu2 %v78_v6  ;;  %775 = vmatmul.f32.gmra.mxu3 %v79_v7 }
 0x142   :  { %v407_v12 = vadd.f32 %v406_v10, %v246_v11  ;;  %292 = vmatmul.f32.gmra.mxu0 %v78_v6  ;;  %453 = vmatmul.f32.gmra.mxu1 %v79_v7 }
 0x144   :  { %999 = vst [vmem:[%s1909_s3 + $0x100] sm:$0xff] %v407_v12  ;;  %v567_v13 = vpop.f32.mrf.mxu2  ;;  %v728_v14 = vpop.f32.mrf.mxu3 }
 0x145   :  { %v568_v15 = vadd.f32 %v567_v13, %v1415_v39 }
 0x147   :  { %v729_v18 = vadd.f32 %v728_v14, %v568_v15  ;;  %v248_v19 = vpop.f32.mrf.mxu0  ;;  %v409_v20 = vpop.f32.mrf.mxu1  ;;  %v92_v14 = vld [vmem:[%s1906_s0 + $0x270] sm:$0xff]  ;;  %v93_v15 = vld [vmem:[%s1906_s0 + $0x278] sm:$0xff] }
 0x148   :  { %v249_v21 = vadd.f32 %v248_v19, %v1406_v33 }
 0x149   :  { %1001 = vst [vmem:[%s1909_s3 + $0x108] sm:$0xff] %v729_v18  ;;  %617 = vmatmul.f32.gmra.mxu2 %v80_v16  ;;  %778 = vmatmul.f32.gmra.mxu3 %v81_v17 }
 0x14a   :  { %v410_v22 = vadd.f32 %v409_v20, %v249_v21  ;;  %295 = vmatmul.f32.gmra.mxu0 %v80_v16  ;;  %456 = vmatmul.f32.gmra.mxu1 %v81_v17 }
 0x14c   :  { %1003 = vst [vmem:[%s1909_s3 + $0x110] sm:$0xff] %v410_v22  ;;  %v570_v23 = vpop.f32.mrf.mxu2  ;;  %v731_v24 = vpop.f32.mrf.mxu3 }
 0x14d   :  { %v571_v25 = vadd.f32 %v570_v23, %v1415_v39 }
 0x14f   :  { %v732_v28 = vadd.f32 %v731_v24, %v571_v25  ;;  %v251_v29 = vpop.f32.mrf.mxu0  ;;  %v412_v30 = vpop.f32.mrf.mxu1  ;;  %v94_v24 = vld [vmem:[%s1906_s0 + $0x280] sm:$0xff]  ;;  %v95_v25 = vld [vmem:[%s1906_s0 + $0x288] sm:$0xff] }
 0x150   :  { %v252_v31 = vadd.f32 %v251_v29, %v1406_v33 }
 0x151   :  { %1005 = vst [vmem:[%s1909_s3 + $0x118] sm:$0xff] %v732_v28  ;;  %620 = vmatmul.f32.gmra.mxu2 %v82_v26  ;;  %781 = vmatmul.f32.gmra.mxu3 %v83_v27 }
 0x152   :  { %v413_v32 = vadd.f32 %v412_v30, %v252_v31  ;;  %298 = vmatmul.f32.gmra.mxu0 %v82_v26  ;;  %459 = vmatmul.f32.gmra.mxu1 %v83_v27 }
 0x154   :  { %1007 = vst [vmem:[%s1909_s3 + $0x120] sm:$0xff] %v413_v32  ;;  %v573_v34 = vpop.f32.mrf.mxu2  ;;  %v734_v35 = vpop.f32.mrf.mxu3 }
 0x155   :  { %v574_v36 = vadd.f32 %v573_v34, %v1415_v39 }
 0x157   :  { %v735_v40 = vadd.f32 %v734_v35, %v574_v36  ;;  %v254_v41 = vpop.f32.mrf.mxu0  ;;  %v415_v42 = vpop.f32.mrf.mxu1  ;;  %v96_v35 = vld [vmem:[%s1906_s0 + $0x290] sm:$0xff]  ;;  %v97_v36 = vld [vmem:[%s1906_s0 + $0x298] sm:$0xff] }
 0x158   :  { %v255_v43 = vadd.f32 %v254_v41, %v1406_v33 }
 0x159   :  { %1009 = vst [vmem:[%s1909_s3 + $0x128] sm:$0xff] %v735_v40  ;;  %623 = vmatmul.f32.gmra.mxu2 %v84_v37  ;;  %784 = vmatmul.f32.gmra.mxu3 %v85_v38 }
 0x15a   :  { %v416_v44 = vadd.f32 %v415_v42, %v255_v43  ;;  %301 = vmatmul.f32.gmra.mxu0 %v84_v37  ;;  %462 = vmatmul.f32.gmra.mxu1 %v85_v38 }
 0x15c   :  { %1011 = vst [vmem:[%s1909_s3 + $0x130] sm:$0xff] %v416_v44  ;;  %v576_v45 = vpop.f32.mrf.mxu2  ;;  %v737_v46 = vpop.f32.mrf.mxu3 }
 0x15d   :  { %v577_v47 = vadd.f32 %v576_v45, %v1415_v39 }
 0x15f   :  { %v738_v50 = vadd.f32 %v737_v46, %v577_v47  ;;  %v257_v51 = vpop.f32.mrf.mxu0  ;;  %v418_v52 = vpop.f32.mrf.mxu1  ;;  %v98_v46 = vld [vmem:[%s1906_s0 + $0x2a0] sm:$0xff]  ;;  %v99_v47 = vld [vmem:[%s1906_s0 + $0x2a8] sm:$0xff] }
 0x160   :  { %v258_v53 = vadd.f32 %v257_v51, %v1406_v33 }
 0x161   :  { %1013 = vst [vmem:[%s1909_s3 + $0x138] sm:$0xff] %v738_v50  ;;  %626 = vmatmul.f32.gmra.mxu2 %v86_v48  ;;  %787 = vmatmul.f32.gmra.mxu3 %v87_v49 }
 0x162   :  { %v419_v54 = vadd.f32 %v418_v52, %v258_v53  ;;  %304 = vmatmul.f32.gmra.mxu0 %v86_v48  ;;  %465 = vmatmul.f32.gmra.mxu1 %v87_v49 }
 0x164   :  { %1015 = vst [vmem:[%s1909_s3 + $0x140] sm:$0xff] %v419_v54  ;;  %v579_v55 = vpop.f32.mrf.mxu2  ;;  %v740_v56 = vpop.f32.mrf.mxu3 }
 0x165   :  { %v580_v57 = vadd.f32 %v579_v55, %v1415_v39 }
 0x167   :  { %v741_v60 = vadd.f32 %v740_v56, %v580_v57  ;;  %v260_v61 = vpop.f32.mrf.mxu0  ;;  %v421_v62 = vpop.f32.mrf.mxu1  ;;  %v100_v56 = vld [vmem:[%s1906_s0 + $0x2b0] sm:$0xff]  ;;  %v101_v57 = vld [vmem:[%s1906_s0 + $0x2b8] sm:$0xff] }
 0x168   :  { %v261_v63 = vadd.f32 %v260_v61, %v1406_v33 }
 0x169   :  { %1017 = vst [vmem:[%s1909_s3 + $0x148] sm:$0xff] %v741_v60  ;;  %629 = vmatmul.f32.gmra.mxu2 %v88_v58  ;;  %790 = vmatmul.f32.gmra.mxu3 %v89_v59 }
 0x16a   :  { %v422_v0 = vadd.f32 %v421_v62, %v261_v63  ;;  %307 = vmatmul.f32.gmra.mxu0 %v88_v58  ;;  %468 = vmatmul.f32.gmra.mxu1 %v89_v59 }
 0x16c   :  { %1019 = vst [vmem:[%s1909_s3 + $0x150] sm:$0xff] %v422_v0  ;;  %v582_v1 = vpop.f32.mrf.mxu2  ;;  %v743_v2 = vpop.f32.mrf.mxu3 }
 0x16d   :  { %v583_v3 = vadd.f32 %v582_v1, %v1415_v39 }
 0x16f   :  { %v744_v6 = vadd.f32 %v743_v2, %v583_v3  ;;  %v263_v7 = vpop.f32.mrf.mxu0  ;;  %v424_v8 = vpop.f32.mrf.mxu1  ;;  %v102_v2 = vld [vmem:[%s1906_s0 + $0x2c0] sm:$0xff]  ;;  %v103_v3 = vld [vmem:[%s1906_s0 + $0x2c8] sm:$0xff] }
 0x170   :  { %v264_v9 = vadd.f32 %v263_v7, %v1406_v33 }
 0x171   :  { %1021 = vst [vmem:[%s1909_s3 + $0x158] sm:$0xff] %v744_v6  ;;  %632 = vmatmul.f32.gmra.mxu2 %v90_v4  ;;  %793 = vmatmul.f32.gmra.mxu3 %v91_v5 }
 0x172   :  { %v425_v10 = vadd.f32 %v424_v8, %v264_v9  ;;  %310 = vmatmul.f32.gmra.mxu0 %v90_v4  ;;  %471 = vmatmul.f32.gmra.mxu1 %v91_v5 }
 0x174   :  { %1023 = vst [vmem:[%s1909_s3 + $0x160] sm:$0xff] %v425_v10  ;;  %v585_v11 = vpop.f32.mrf.mxu2  ;;  %v746_v12 = vpop.f32.mrf.mxu3 }
 0x175   :  { %v586_v13 = vadd.f32 %v585_v11, %v1415_v39 }
 0x177   :  { %v747_v16 = vadd.f32 %v746_v12, %v586_v13  ;;  %v266_v17 = vpop.f32.mrf.mxu0  ;;  %v427_v18 = vpop.f32.mrf.mxu1  ;;  %v104_v12 = vld [vmem:[%s1906_s0 + $0x2d0] sm:$0xff]  ;;  %v105_v13 = vld [vmem:[%s1906_s0 + $0x2d8] sm:$0xff] }
 0x178   :  { %v267_v19 = vadd.f32 %v266_v17, %v1406_v33 }
 0x179   :  { %1025 = vst [vmem:[%s1909_s3 + $0x168] sm:$0xff] %v747_v16  ;;  %635 = vmatmul.f32.gmra.mxu2 %v92_v14  ;;  %796 = vmatmul.f32.gmra.mxu3 %v93_v15 }
 0x17a   :  { %v428_v20 = vadd.f32 %v427_v18, %v267_v19  ;;  %313 = vmatmul.f32.gmra.mxu0 %v92_v14  ;;  %474 = vmatmul.f32.gmra.mxu1 %v93_v15 }
 0x17c   :  { %1027 = vst [vmem:[%s1909_s3 + $0x170] sm:$0xff] %v428_v20  ;;  %v588_v21 = vpop.f32.mrf.mxu2  ;;  %v749_v22 = vpop.f32.mrf.mxu3 }
 0x17d   :  { %v589_v23 = vadd.f32 %v588_v21, %v1415_v39 }
 0x17f   :  { %v750_v26 = vadd.f32 %v749_v22, %v589_v23  ;;  %v269_v27 = vpop.f32.mrf.mxu0  ;;  %v430_v28 = vpop.f32.mrf.mxu1  ;;  %v106_v22 = vld [vmem:[%s1906_s0 + $0x2e0] sm:$0xff]  ;;  %v107_v23 = vld [vmem:[%s1906_s0 + $0x2e8] sm:$0xff] }
 0x180   :  { %v270_v29 = vadd.f32 %v269_v27, %v1406_v33 }
 0x181   :  { %1029 = vst [vmem:[%s1909_s3 + $0x178] sm:$0xff] %v750_v26  ;;  %638 = vmatmul.f32.gmra.mxu2 %v94_v24  ;;  %799 = vmatmul.f32.gmra.mxu3 %v95_v25 }
 0x182   :  { %v431_v30 = vadd.f32 %v430_v28, %v270_v29  ;;  %316 = vmatmul.f32.gmra.mxu0 %v94_v24  ;;  %477 = vmatmul.f32.gmra.mxu1 %v95_v25 }
 0x184   :  { %1031 = vst [vmem:[%s1909_s3 + $0x180] sm:$0xff] %v431_v30  ;;  %v591_v31 = vpop.f32.mrf.mxu2  ;;  %v752_v32 = vpop.f32.mrf.mxu3 }
 0x185   :  { %v592_v34 = vadd.f32 %v591_v31, %v1415_v39 }
 0x187   :  { %v753_v37 = vadd.f32 %v752_v32, %v592_v34  ;;  %v272_v38 = vpop.f32.mrf.mxu0  ;;  %v433_v40 = vpop.f32.mrf.mxu1  ;;  %v108_v32 = vld [vmem:[%s1906_s0 + $0x2f0] sm:$0xff]  ;;  %v109_v34 = vld [vmem:[%s1906_s0 + $0x2f8] sm:$0xff] }
 0x188   :  { %v273_v41 = vadd.f32 %v272_v38, %v1406_v33 }
 0x189   :  { %1033 = vst [vmem:[%s1909_s3 + $0x188] sm:$0xff] %v753_v37  ;;  %641 = vmatmul.f32.gmra.mxu2 %v96_v35  ;;  %802 = vmatmul.f32.gmra.mxu3 %v97_v36 }
 0x18a   :  { %v434_v42 = vadd.f32 %v433_v40, %v273_v41  ;;  %319 = vmatmul.f32.gmra.mxu0 %v96_v35  ;;  %480 = vmatmul.f32.gmra.mxu1 %v97_v36 }
 0x18c   :  { %1035 = vst [vmem:[%s1909_s3 + $0x190] sm:$0xff] %v434_v42  ;;  %v594_v43 = vpop.f32.mrf.mxu2  ;;  %v755_v44 = vpop.f32.mrf.mxu3 }
 0x18d   :  { %v595_v45 = vadd.f32 %v594_v43, %v1415_v39 }
 0x18f   :  { %v756_v48 = vadd.f32 %v755_v44, %v595_v45  ;;  %v275_v49 = vpop.f32.mrf.mxu0  ;;  %v436_v50 = vpop.f32.mrf.mxu1 }
 0x190   :  { %v276_v51 = vadd.f32 %v275_v49, %v1406_v33 }
 0x191   :  { %1037 = vst [vmem:[%s1909_s3 + $0x198] sm:$0xff] %v756_v48  ;;  %644 = vmatmul.f32.gmra.mxu2 %v98_v46  ;;  %805 = vmatmul.f32.gmra.mxu3 %v99_v47 }
 0x192   :  { %v437_v52 = vadd.f32 %v436_v50, %v276_v51  ;;  %322 = vmatmul.f32.gmra.mxu0 %v98_v46  ;;  %483 = vmatmul.f32.gmra.mxu1 %v99_v47 }
 0x194   :  { %1039 = vst [vmem:[%s1909_s3 + $0x1a0] sm:$0xff] %v437_v52  ;;  %v597_v53 = vpop.f32.mrf.mxu2  ;;  %v758_v54 = vpop.f32.mrf.mxu3 }
 0x195   :  { %v598_v55 = vadd.f32 %v597_v53, %v1415_v39 }
 0x197   :  { %v759_v58 = vadd.f32 %v758_v54, %v598_v55  ;;  %v278_v59 = vpop.f32.mrf.mxu0  ;;  %v439_v60 = vpop.f32.mrf.mxu1 }
 0x198   :  { %v279_v61 = vadd.f32 %v278_v59, %v1406_v33 }
 0x199   :  { %1041 = vst [vmem:[%s1909_s3 + $0x1a8] sm:$0xff] %v759_v58  ;;  %647 = vmatmul.f32.gmra.mxu2 %v100_v56  ;;  %808 = vmatmul.f32.gmra.mxu3 %v101_v57 }
 0x19a   :  { %v440_v62 = vadd.f32 %v439_v60, %v279_v61  ;;  %325 = vmatmul.f32.gmra.mxu0 %v100_v56  ;;  %486 = vmatmul.f32.gmra.mxu1 %v101_v57 }
 0x19c   :  { %1043 = vst [vmem:[%s1909_s3 + $0x1b0] sm:$0xff] %v440_v62  ;;  %v600_v63 = vpop.f32.mrf.mxu2  ;;  %v761_v0 = vpop.f32.mrf.mxu3 }
 0x19d   :  { %v601_v1 = vadd.f32 %v600_v63, %v1415_v39 }
 0x19f   :  { %v762_v4 = vadd.f32 %v761_v0, %v601_v1  ;;  %v281_v5 = vpop.f32.mrf.mxu0  ;;  %v442_v6 = vpop.f32.mrf.mxu1 }
 0x1a0   :  { %v282_v7 = vadd.f32 %v281_v5, %v1406_v33 }
 0x1a1   :  { %1045 = vst [vmem:[%s1909_s3 + $0x1b8] sm:$0xff] %v762_v4  ;;  %650 = vmatmul.f32.gmra.mxu2 %v102_v2  ;;  %811 = vmatmul.f32.gmra.mxu3 %v103_v3 }
 0x1a2   :  { %v443_v8 = vadd.f32 %v442_v6, %v282_v7  ;;  %328 = vmatmul.f32.gmra.mxu0 %v102_v2  ;;  %489 = vmatmul.f32.gmra.mxu1 %v103_v3 }
 0x1a4   :  { %1047 = vst [vmem:[%s1909_s3 + $0x1c0] sm:$0xff] %v443_v8  ;;  %v603_v9 = vpop.f32.mrf.mxu2  ;;  %v764_v10 = vpop.f32.mrf.mxu3 }
 0x1a5   :  { %v604_v11 = vadd.f32 %v603_v9, %v1415_v39 }
 0x1a7   :  { %v765_v14 = vadd.f32 %v764_v10, %v604_v11  ;;  %v284_v15 = vpop.f32.mrf.mxu0  ;;  %v445_v16 = vpop.f32.mrf.mxu1 }
 0x1a8   :  { %v285_v17 = vadd.f32 %v284_v15, %v1406_v33 }
 0x1a9   :  { %1049 = vst [vmem:[%s1909_s3 + $0x1c8] sm:$0xff] %v765_v14  ;;  %653 = vmatmul.f32.gmra.mxu2 %v104_v12  ;;  %814 = vmatmul.f32.gmra.mxu3 %v105_v13 }
 0x1aa   :  { %v446_v18 = vadd.f32 %v445_v16, %v285_v17  ;;  %331 = vmatmul.f32.gmra.mxu0 %v104_v12  ;;  %492 = vmatmul.f32.gmra.mxu1 %v105_v13 }
 0x1ac   :  { %1051 = vst [vmem:[%s1909_s3 + $0x1d0] sm:$0xff] %v446_v18  ;;  %v606_v19 = vpop.f32.mrf.mxu2  ;;  %v767_v20 = vpop.f32.mrf.mxu3 }
 0x1ad   :  { %v607_v21 = vadd.f32 %v606_v19, %v1415_v39 }
 0x1af   :  { %v768_v24 = vadd.f32 %v767_v20, %v607_v21  ;;  %v287_v25 = vpop.f32.mrf.mxu0  ;;  %v448_v26 = vpop.f32.mrf.mxu1 }
 0x1b0   :  { %v288_v27 = vadd.f32 %v287_v25, %v1406_v33 }
 0x1b1   :  { %1053 = vst [vmem:[%s1909_s3 + $0x1d8] sm:$0xff] %v768_v24  ;;  %656 = vmatmul.f32.gmra.mxu2 %v106_v22  ;;  %817 = vmatmul.f32.gmra.mxu3 %v107_v23 }
 0x1b2   :  { %v449_v28 = vadd.f32 %v448_v26, %v288_v27  ;;  %334 = vmatmul.f32.gmra.mxu0 %v106_v22  ;;  %495 = vmatmul.f32.gmra.mxu1 %v107_v23 }
 0x1b4   :  { %1055 = vst [vmem:[%s1909_s3 + $0x1e0] sm:$0xff] %v449_v28  ;;  %v609_v29 = vpop.f32.mrf.mxu2  ;;  %v770_v30 = vpop.f32.mrf.mxu3 }
 0x1b5   :  { %v610_v31 = vadd.f32 %v609_v29, %v1415_v39 }
 0x1b7   :  { %v771_v35 = vadd.f32 %v770_v30, %v610_v31  ;;  %v290_v36 = vpop.f32.mrf.mxu0  ;;  %v451_v37 = vpop.f32.mrf.mxu1 }
 0x1b8   :  { %v291_v38 = vadd.f32 %v290_v36, %v1406_v33 }
 0x1b9   :  { %1057 = vst [vmem:[%s1909_s3 + $0x1e8] sm:$0xff] %v771_v35  ;;  %659 = vmatmul.f32.gmra.mxu2 %v108_v32  ;;  %820 = vmatmul.f32.gmra.mxu3 %v109_v34 }
 0x1ba   :  { %v452_v40 = vadd.f32 %v451_v37, %v291_v38  ;;  %337 = vmatmul.f32.gmra.mxu0 %v108_v32  ;;  %498 = vmatmul.f32.gmra.mxu1 %v109_v34 }
 0x1bc   :  { %1059 = vst [vmem:[%s1909_s3 + $0x1f0] sm:$0xff] %v452_v40  ;;  %v612_v41 = vpop.f32.mrf.mxu2  ;;  %v773_v42 = vpop.f32.mrf.mxu3 }
 0x1bd   :  { %v613_v43 = vadd.f32 %v612_v41, %v1415_v39 }
 0x1bf   :  { %v774_v44 = vadd.f32 %v773_v42, %v613_v43  ;;  %v293_v45 = vpop.f32.mrf.mxu0  ;;  %v454_v46 = vpop.f32.mrf.mxu1 }
 0x1c0   :  { %v294_v47 = vadd.f32 %v293_v45, %v1406_v33 }
 0x1c1   :  { %1061 = vst [vmem:[%s1909_s3 + $0x1f8] sm:$0xff] %v774_v44 }
 0x1c2   :  { %v455_v48 = vadd.f32 %v454_v46, %v294_v47 }
 0x1c4   :  { %1063 = vst [vmem:[%s1909_s3 + $0x200] sm:$0xff] %v455_v48  ;;  %v615_v49 = vpop.f32.mrf.mxu2  ;;  %v776_v50 = vpop.f32.mrf.mxu3 }
 0x1c5   :  { %v616_v51 = vadd.f32 %v615_v49, %v1415_v39 }
 0x1c7   :  { %v777_v52 = vadd.f32 %v776_v50, %v616_v51  ;;  %v296_v53 = vpop.f32.mrf.mxu0  ;;  %v457_v54 = vpop.f32.mrf.mxu1 }
 0x1c8   :  { %v297_v55 = vadd.f32 %v296_v53, %v1406_v33 }
 0x1c9   :  { %1065 = vst [vmem:[%s1909_s3 + $0x208] sm:$0xff] %v777_v52 }
 0x1ca   :  { %v458_v56 = vadd.f32 %v457_v54, %v297_v55 }
 0x1cc   :  { %1067 = vst [vmem:[%s1909_s3 + $0x210] sm:$0xff] %v458_v56  ;;  %v618_v57 = vpop.f32.mrf.mxu2  ;;  %v779_v58 = vpop.f32.mrf.mxu3 }
 0x1cd   :  { %v619_v59 = vadd.f32 %v618_v57, %v1415_v39 }
 0x1cf   :  { %v780_v60 = vadd.f32 %v779_v58, %v619_v59  ;;  %v299_v61 = vpop.f32.mrf.mxu0  ;;  %v460_v62 = vpop.f32.mrf.mxu1 }
 0x1d0   :  { %v300_v63 = vadd.f32 %v299_v61, %v1406_v33 }
 0x1d1   :  { %1069 = vst [vmem:[%s1909_s3 + $0x218] sm:$0xff] %v780_v60 }
 0x1d2   :  { %v461_v0 = vadd.f32 %v460_v62, %v300_v63 }
 0x1d4   :  { %1071 = vst [vmem:[%s1909_s3 + $0x220] sm:$0xff] %v461_v0  ;;  %v621_v1 = vpop.f32.mrf.mxu2  ;;  %v782_v2 = vpop.f32.mrf.mxu3 }
 0x1d5   :  { %v622_v3 = vadd.f32 %v621_v1, %v1415_v39 }
 0x1d7   :  { %v783_v4 = vadd.f32 %v782_v2, %v622_v3  ;;  %v302_v5 = vpop.f32.mrf.mxu0  ;;  %v463_v6 = vpop.f32.mrf.mxu1 }
 0x1d8   :  { %v303_v7 = vadd.f32 %v302_v5, %v1406_v33 }
 0x1d9   :  { %1073 = vst [vmem:[%s1909_s3 + $0x228] sm:$0xff] %v783_v4 }
 0x1da   :  { %v464_v8 = vadd.f32 %v463_v6, %v303_v7 }
 0x1dc   :  { %1075 = vst [vmem:[%s1909_s3 + $0x230] sm:$0xff] %v464_v8  ;;  %v624_v9 = vpop.f32.mrf.mxu2  ;;  %v785_v10 = vpop.f32.mrf.mxu3 }
 0x1dd   :  { %v625_v11 = vadd.f32 %v624_v9, %v1415_v39 }
 0x1df   :  { %v786_v12 = vadd.f32 %v785_v10, %v625_v11  ;;  %v305_v13 = vpop.f32.mrf.mxu0  ;;  %v466_v14 = vpop.f32.mrf.mxu1 }
 0x1e0   :  { %v306_v15 = vadd.f32 %v305_v13, %v1406_v33 }
 0x1e1   :  { %1077 = vst [vmem:[%s1909_s3 + $0x238] sm:$0xff] %v786_v12 }
 0x1e2   :  { %v467_v16 = vadd.f32 %v466_v14, %v306_v15 }
 0x1e4   :  { %1079 = vst [vmem:[%s1909_s3 + $0x240] sm:$0xff] %v467_v16  ;;  %v627_v17 = vpop.f32.mrf.mxu2  ;;  %v788_v18 = vpop.f32.mrf.mxu3 }
 0x1e5   :  { %v628_v19 = vadd.f32 %v627_v17, %v1415_v39 }
 0x1e7   :  { %v789_v20 = vadd.f32 %v788_v18, %v628_v19  ;;  %v308_v21 = vpop.f32.mrf.mxu0  ;;  %v469_v22 = vpop.f32.mrf.mxu1 }
 0x1e8   :  { %v309_v23 = vadd.f32 %v308_v21, %v1406_v33 }
 0x1e9   :  { %1081 = vst [vmem:[%s1909_s3 + $0x248] sm:$0xff] %v789_v20 }
 0x1ea   :  { %v470_v24 = vadd.f32 %v469_v22, %v309_v23 }
 0x1ec   :  { %1083 = vst [vmem:[%s1909_s3 + $0x250] sm:$0xff] %v470_v24  ;;  %v630_v25 = vpop.f32.mrf.mxu2  ;;  %v791_v26 = vpop.f32.mrf.mxu3 }
 0x1ed   :  { %v631_v27 = vadd.f32 %v630_v25, %v1415_v39 }
 0x1ef   :  { %v792_v28 = vadd.f32 %v791_v26, %v631_v27  ;;  %v311_v29 = vpop.f32.mrf.mxu0  ;;  %v472_v30 = vpop.f32.mrf.mxu1 }
 0x1f1   :  { %1085 = vst [vmem:[%s1909_s3 + $0x258] sm:$0xff] %v792_v28 }
 0x1f4   :  { %v633_v33 = vpop.f32.mrf.mxu2  ;;  %v794_v31 = vpop.f32.mrf.mxu3 }
 0x1f7   :  { %v314_v32 = vpop.f32.mrf.mxu0  ;;  %v475_v34 = vpop.f32.mrf.mxu1 }
 0x1fc   :  { %v636_v35 = vpop.f32.mrf.mxu2  ;;  %v797_v36 = vpop.f32.mrf.mxu3 }
 0x1ff   :  { %v317_v37 = vpop.f32.mrf.mxu0  ;;  %v478_v38 = vpop.f32.mrf.mxu1 }
 0x204   :  { %v639_v40 = vpop.f32.mrf.mxu2  ;;  %v800_v41 = vpop.f32.mrf.mxu3 }
 0x207   :  { %v320_v42 = vpop.f32.mrf.mxu0  ;;  %v481_v43 = vpop.f32.mrf.mxu1 }
 0x20c   :  { %v642_v39 = vpop.f32.mrf.mxu2  ;;  %v803_v44 = vpop.f32.mrf.mxu3 }
 0x20f   :  { %v323_v45 = vpop.f32.mrf.mxu0  ;;  %v484_v46 = vpop.f32.mrf.mxu1 }
 0x214   :  { %v645_v47 = vpop.f32.mrf.mxu2  ;;  %v806_v48 = vpop.f32.mrf.mxu3 }
 0x217   :  { %v326_v49 = vpop.f32.mrf.mxu0  ;;  %v487_v50 = vpop.f32.mrf.mxu1 }
 0x21c   :  { %v648_v51 = vpop.f32.mrf.mxu2  ;;  %v809_v52 = vpop.f32.mrf.mxu3 }
 0x21f   :  { %v329_v53 = vpop.f32.mrf.mxu0  ;;  %v490_v54 = vpop.f32.mrf.mxu1 }
 0x224   :  { %v651_v55 = vpop.f32.mrf.mxu2  ;;  %v812_v56 = vpop.f32.mrf.mxu3 }
 0x227   :  { %v332_v57 = vpop.f32.mrf.mxu0  ;;  %v493_v58 = vpop.f32.mrf.mxu1 }
 0x22c   :  { %v654_v59 = vpop.f32.mrf.mxu2  ;;  %v815_v60 = vpop.f32.mrf.mxu3 }
 0x22f   :  { %v335_v61 = vpop.f32.mrf.mxu0  ;;  %v496_v62 = vpop.f32.mrf.mxu1 }
 0x234   :  { %v657_v63 = vpop.f32.mrf.mxu2  ;;  %v818_v0 = vpop.f32.mrf.mxu3 }
 0x237   :  { %v338_v1 = vpop.f32.mrf.mxu0  ;;  %v499_v2 = vpop.f32.mrf.mxu1 }
 0x23c   :  { %v660_v3 = vpop.f32.mrf.mxu2  ;;  %v821_v4 = vpop.f32.mrf.mxu3 }

</bundles_post_ra>
